<compile_context>
chip_gen: v6e
topology: v6e:2x2x1
jax: 0.10.0
libtpu: 0.0.40
codegen_flags: <defaults>
</compile_context>

<pallas_src>
import functools

import jax
import jax.numpy as jnp
from jax.experimental import pallas as pl
from jax.experimental.pallas import tpu as pltpu

NPAD = 128  # lane-dense padded output width (>= O, multiple of 128)


def mlp_kernel(x_ref, w1_ref, b1_ref, w2_ref, b2_ref, o_ref):
    # Layer 1: bf16 x bf16 -> f32 accumulation on the MXU.
    x_bf = x_ref[...].astype(jnp.bfloat16)                     # [B, D] (VMEM cast)
    h = jnp.dot(x_bf, w1_ref[...], preferred_element_type=jnp.float32)
    h = jnp.maximum(h + b1_ref[...], 0.0)                      # [B, H] f32

    # Layer 2: tiny 128x128 matmul, bf16 operands, f32 accumulation.
    y = jnp.dot(h.astype(jnp.bfloat16), w2_ref[...],
                preferred_element_type=jnp.float32)             # [B, NPAD]
    o_ref[...] = (y + b2_ref[...]).astype(o_ref.dtype)          # lane-dense store


def prepare_params(w1, b1, w2, b2):
    """One-time weight prep (call once at init, NOT per forward call).

    w1: [D, H] f32; b1: [H] f32; w2: [H, O] f32; b2: [O] f32.
    Returns device-ready arrays consumed directly by `model_square_forward`.
    """
    D, H = w1.shape
    O = w2.shape[1]
    assert O <= NPAD
    w1_bf = jnp.asarray(w1, jnp.bfloat16)                               # [D, H]
    b1r = jnp.asarray(b1, jnp.float32).reshape(1, H)                    # [1, H]
    w2_pad = (jnp.zeros((H, NPAD), jnp.float32).at[:, :O].set(w2)
              .astype(jnp.bfloat16))                                    # [H, NPAD]
    b2_pad = jnp.zeros((1, NPAD), jnp.float32).at[0, :O].set(b2)        # [1, NPAD]
    return {"w1": w1_bf, "b1": b1r, "w2": w2_pad, "b2": b2_pad, "out_dim": O}


@functools.partial(jax.jit, static_argnames=("out_dim",))
def _forward_jit(x, w1_bf, b1r, w2_pad, b2_pad, *, out_dim):
    B, D = x.shape
    H = w1_bf.shape[1]

    cost = pl.CostEstimate(
        flops=2 * B * D * H + 2 * B * H * NPAD,
        transcendentals=0,
        bytes_accessed=(4 * B * D            # x f32
                        + 2 * D * H          # W1 bf16
                        + 4 * H              # b1 f32
                        + 2 * H * NPAD       # W2 bf16
                        + 4 * NPAD           # b2 f32
                        + 4 * B * NPAD),     # out f32
    )

    out_pad = pl.pallas_call(
        mlp_kernel,
        out_shape=jax.ShapeDtypeStruct((B, NPAD), jnp.float32),
        cost_estimate=cost,
    )(x, w1_bf, b1r, w2_pad, b2_pad)

    # Drop the lane padding outside the kernel.
    return out_pad[:, :out_dim]


def model_square_forward(x, params):
    """x: [B, D] f32, params from `prepare_params` -> [B, O] f32."""
    return _forward_jit(x, params["w1"], params["b1"], params["w2"],
                        params["b2"], out_dim=params["out_dim"])


# TODO(synk): for repeated inference at B=8, batch many rows per call (and on
# v7x add a "parallel" B grid axis with >=256-row tiles to fill both
# TensorCores), or keep W1 resident in VMEM across calls via a cross-call
# prefetch (P10).  That structural change is outside this single forward pass.


if __name__ == "__main__":
    # Shapes implied by the module: inp = 64*64 = 4096, hidden = 128, out = 2.
    B, D, H, O = 8, 64 * 64, 128, 2

    key = jax.random.PRNGKey(0)
    kx, kw1, kb1, kw2, kb2 = jax.random.split(key, 5)

    # Deterministic parameter init (uniform +/- 1/sqrt(fan_in), like nn.Linear).
    lim1 = 1.0 / jnp.sqrt(jnp.float32(D))
    lim2 = 1.0 / jnp.sqrt(jnp.float32(H))
    w1 = jax.random.uniform(kw1, (D, H), jnp.float32, -lim1, lim1)
    b1 = jax.random.uniform(kb1, (H,), jnp.float32, -lim1, lim1)
    w2 = jax.random.uniform(kw2, (H, O), jnp.float32, -lim2, lim2)
    b2 = jax.random.uniform(kb2, (O,), jnp.float32, -lim2, lim2)

    # Example input: flattened 64x64 "images" in [0, 1).
    x = jax.random.uniform(kx, (B, D), jnp.float32)

    # One-time weight prep (hot path only sees device-ready arrays).
    params = jax.block_until_ready(prepare_params(w1, b1, w2, b2))

    out = model_square_forward(x, params)
    out = jax.block_until_ready(out)

    # Reference matching the kernel's precision choices (bf16 operands,
    # f32 accumulation on both layers).
    h_ref = jnp.dot(x.astype(jnp.bfloat16), w1.astype(jnp.bfloat16),
                    preferred_element_type=jnp.float32)
    h_ref = jnp.maximum(h_ref + b1, 0.0)
    ref_bf = jnp.dot(h_ref.astype(jnp.bfloat16), w2.astype(jnp.bfloat16),
                     preferred_element_type=jnp.float32) + b2

    # Pure f32 reference (PyTorch semantics) with looser tolerance.
    ref_f32 = jnp.maximum(x @ w1 + b1, 0.0) @ w2 + b2

    assert out.shape == (B, O)
    assert jnp.allclose(out, ref_bf, atol=1e-3, rtol=1e-3)
    assert jnp.allclose(out, ref_f32, atol=3e-2, rtol=3e-2)

    print("KERNEL_OK")
</pallas_src>

<mosaic_0001>
module attributes {stable_mosaic.version = 11 : i64} {
  func.func @mlp_kernel(%arg0: memref<8x4096xf32, #tpu.memory_space<vmem>>, %arg1: memref<4096x128xbf16, #tpu.memory_space<vmem>>, %arg2: memref<1x128xf32, #tpu.memory_space<vmem>>, %arg3: memref<128x128xbf16, #tpu.memory_space<vmem>>, %arg4: memref<1x128xf32, #tpu.memory_space<vmem>>, %arg5: memref<8x128xf32, #tpu.memory_space<vmem>>) attributes {dimension_semantics = [], scalar_prefetch = 0 : i64, scratch_operands = 0 : i64, tpu.core_type = #tpu.core_type<tc>} {
    %c0 = arith.constant 0 : index
    %c0_0 = arith.constant 0 : index
    %0 = vector.load %arg0[%c0, %c0_0] : memref<8x4096xf32, #tpu.memory_space<vmem>>, vector<8x4096xf32>
    %1 = arith.truncf %0 : vector<8x4096xf32> to vector<8x4096xbf16>
    %c0_1 = arith.constant 0 : index
    %c0_2 = arith.constant 0 : index
    %2 = vector.load %arg1[%c0_1, %c0_2] : memref<4096x128xbf16, #tpu.memory_space<vmem>>, vector<4096x128xbf16>
    %cst = arith.constant dense<0.000000e+00> : vector<8x128xf32>
    %3 = tpu.matmul %1, %2, %cst {dimension_numbers = #tpu.dot_dimension_numbers<[1], [0], [0], [1], [0, 0, 1, 1], [], []>} : vector<8x4096xbf16>, vector<4096x128xbf16>, vector<8x128xf32> -> vector<8x128xf32>
    %c0_3 = arith.constant 0 : index
    %c0_4 = arith.constant 0 : index
    %4 = vector.load %arg2[%c0_3, %c0_4] : memref<1x128xf32, #tpu.memory_space<vmem>>, vector<1x128xf32>
    %5 = vector.broadcast %4 : vector<1x128xf32> to vector<8x128xf32>
    %6 = arith.addf %3, %5 : vector<8x128xf32>
    %cst_5 = arith.constant 0.000000e+00 : f32
    %7 = vector.broadcast %cst_5 : f32 to vector<8x128xf32>
    %8 = arith.maximumf %6, %7 : vector<8x128xf32>
    %9 = arith.truncf %8 : vector<8x128xf32> to vector<8x128xbf16>
    %c0_6 = arith.constant 0 : index
    %c0_7 = arith.constant 0 : index
    %10 = vector.load %arg3[%c0_6, %c0_7] : memref<128x128xbf16, #tpu.memory_space<vmem>>, vector<128x128xbf16>
    %cst_8 = arith.constant dense<0.000000e+00> : vector<8x128xf32>
    %11 = tpu.matmul %9, %10, %cst_8 {dimension_numbers = #tpu.dot_dimension_numbers<[1], [0], [0], [1], [0, 0, 1, 1], [], []>} : vector<8x128xbf16>, vector<128x128xbf16>, vector<8x128xf32> -> vector<8x128xf32>
    %c0_9 = arith.constant 0 : index
    %c0_10 = arith.constant 0 : index
    %12 = vector.load %arg4[%c0_9, %c0_10] : memref<1x128xf32, #tpu.memory_space<vmem>>, vector<1x128xf32>
    %13 = vector.broadcast %12 : vector<1x128xf32> to vector<8x128xf32>
    %14 = arith.addf %11, %13 : vector<8x128xf32>
    %c0_11 = arith.constant 0 : index
    %c0_12 = arith.constant 0 : index
    %15 = vector.load %arg5[%c0_11, %c0_12] : memref<8x128xf32, #tpu.memory_space<vmem>>, vector<8x128xf32>
    tpu.vector_store %arg5[%c0_11, %c0_12], %14 {strides = array<i32>} : memref<8x128xf32, #tpu.memory_space<vmem>>, vector<8x128xf32>,
    return
  }
}

</mosaic_0001>

<bundles_post_ra>
// kernel: _forward_jit.1
= control target key start
LH: loop header
LB: loop body
LE: loop exit
PB: predicated region body
PF: predicated region fallthrough
CT: control target
= control target key end

     0   :  { %10 = vsyncpa [#allocation3], 0  ;;  %s3979_s0 = inlined_call_operand.hbm [shape: f32[8,4096], index: 0, kind: input, shape index: {}]   ;;  %s3980_s1 = inlined_call_operand.hbm [shape: bf16[4096,128], index: 1, kind: input, shape index: {}]   ;;  %s3981_s2 = inlined_call_operand.vmem [shape: f32[1,128], index: 2, kind: input, shape index: {}]   ;;  %s3982_s3 = inlined_call_operand.hbm [shape: bf16[128,128], index: 3, kind: input, shape index: {}]   ;;  %s3983_s4 = inlined_call_operand.vmem [shape: f32[1,128], index: 4, kind: input, shape index: {}]   ;;  %s3984_s5 = inlined_call_operand.vmem [shape: f32[8,128], index: 5, kind: output, shape index: {}]  }
   0x1   :  { %11 = vsyncpa [#allocation5], 0  ;;  %s3921_s18 = smov [#allocation4]  }
   0x2   :  { %s27_s19 = sshll.u32 %s3921_s18, 4  ;;  %s28_s19 = int_to_ptr.vmem [resolvable:$true] %s27_s19 }
   0x3   :  { %s3865_s20 = scalar_lea.vmem %s28_s19, 32768  ;;  %p3870_p1 = scmp.lt.s32.totalorder %s28_s19, %s28_s19 }
   0x4   :  { %p3866_p0 = scmp.ne.s32.totalorder %s28_s19, %s3865_s20  ;;  %p3871_p2 = scmp.lt.s32.totalorder %s3865_s20, %s3865_s20 }
   0x6   :  { %p3872_p3 = por %p3871_p2, %p3870_p1 }
   0x8   :  { %p3873_p4 = pnand %p3872_p3, %p3866_p0 }
   0xa   :  { %3876 = shalt.err (!%p3873_p4)
}
   0xb   :  { %s3922_s21 = smov 64   ;;  %s3923_s22 = smov 4  }
   0xc   :  { %33 = dma.hbm_to_vmem [thread:$0]  %s3980_s1, 32768, %s28_s19, [#allocation5], %s3922_s21, %s3922_s21, %s3923_s22  }
   0xd   :  { %s3924_s25 = smov [#allocation2]   ;;  %s3925_s27 = smov [#allocation6]  }
   0xe   :  { %s18_s26 = sshll.u32 %s3924_s25, 4  ;;  %s41_s28 = sshll.u32 %s3925_s27, 4  ;;  %s19_s26 = int_to_ptr.vmem [resolvable:$true] %s18_s26  ;;  %s42_s28 = int_to_ptr.vmem [resolvable:$true] %s41_s28 }
   0xf   :  { %s3885_s29 = scalar_lea.vmem %s19_s26, 4096  ;;  %p3890_p6 = scmp.lt.s32.totalorder %s19_s26, %s19_s26 }
  0x10   :  { %p3886_p5 = scmp.ne.s32.totalorder %s19_s26, %s3885_s29  ;;  %p3891_p7 = scmp.lt.s32.totalorder %s3885_s29, %s3885_s29 }
  0x12   :  { %p3892_p8 = por %p3891_p7, %p3890_p6 }
  0x14   :  { %p3893_p9 = pnand %p3892_p8, %p3886_p5 }
  0x16   :  { %3896 = shalt.err (!%p3893_p9)
}
  0x17   :  { %21 = dma.hbm_to_vmem [thread:$0]  %s3979_s0, 4096, %s19_s26, [#allocation3]  }
  0x18   :  { %s3905_s7 = scalar_lea.vmem %s42_s28, 1024  ;;  %p3910_p11 = scmp.lt.s32.totalorder %s42_s28, %s42_s28 }
  0x19   :  { %p3906_p10 = scmp.ne.s32.totalorder %s42_s28, %s3905_s7  ;;  %p3911_p12 = scmp.lt.s32.totalorder %s3905_s7, %s3905_s7 }
  0x1b   :  { %p3912_p13 = por %p3911_p12, %p3910_p11 }
  0x1d   :  { %p3913_p0 = pnand %p3912_p13, %p3906_p10 }
  0x1f   :  { %3916 = shalt.err (!%p3913_p0)
}
  0x20   :  { %47 = dma.hbm_to_vmem [thread:$0]  %s3982_s3, 1024, %s42_s28, [#allocation5], %s3922_s21, %s3922_s21, %s3923_s22  }
  0x21   :  { %3917 = dma.done.wait [#allocation3], 4096  }
  0x22   :  { %3918 = vsyncadd [#allocation3], 4294963200 }
  0x23   :  { %3919 = dma.done.wait [#allocation5], 33792  }
  0x24   :  { %3920 = vsyncadd [#allocation5], 4294933504  ;;  %v3593_v0 = vld [vmem:[#allocation4 + $0x78] sm:$0xff]   ;;  %v3597_v4 = vld [vmem:[#allocation4 + $0x70] sm:$0xff]   ;;  %vm3927_vm0 = vmmov 0  }
  0x25   :  { %v3594_v1 = vld [vmem:[#allocation4 + $0xf8] sm:$0xff]   ;;  %3205 = vmatprep.subr.bf16.mxu0 %v3593_v0  ;;  %v3598_v5 = vld [vmem:[#allocation4 + $0xf0] sm:$0xff]   ;;  %v3601_v8 = vld [vmem:[#allocation4 + $0x68] sm:$0xff]  }
  0x26   :  { %v3595_v2 = vld [vmem:[#allocation4 + $0x38] sm:$0xff]   ;;  %3227 = vmatprep.subr.bf16.mxu1 %v3594_v1  ;;  %v3599_v6 = vld [vmem:[#allocation4 + $0x30] sm:$0xff]   ;;  %v3602_v9 = vld [vmem:[#allocation4 + $0xe8] sm:$0xff]  }
  0x27   :  { %v3596_v3 = vld [vmem:[#allocation4 + $0xb8] sm:$0xff]   ;;  %3206 = vmatpush3.bf16.msra.mxu0 %v3595_v2  ;;  %v3600_v7 = vld [vmem:[#allocation4 + $0xb0] sm:$0xff]   ;;  %v3603_v10 = vld [vmem:[#allocation4 + $0x28] sm:$0xff]  }
  0x28   :  { %3228 = vmatpush3.bf16.msra.mxu1 %v3596_v3  ;;  %3207 = vmatprep.subr.bf16.mxu0 %v3597_v4  ;;  %v3604_v11 = vld [vmem:[#allocation4 + $0xa8] sm:$0xff]   ;;  %v3605_v12 = vld [vmem:[#allocation4 + $0x60] sm:$0xff]   ;;  %v3609_v16 = vld [vmem:[#allocation4 + $0x58] sm:$0xff]  }
  0x29   :  { %3229 = vmatprep.subr.bf16.mxu1 %v3598_v5  ;;  %v3606_v13 = vld [vmem:[#allocation4 + $0xe0] sm:$0xff]   ;;  %v3610_v17 = vld [vmem:[#allocation4 + $0xd8] sm:$0xff]   ;;  %v3613_v20 = vld [vmem:[#allocation4 + $0x50] sm:$0xff]  }
  0x2a   :  { %v3607_v14 = vld [vmem:[#allocation4 + $0x20] sm:$0xff]   ;;  %v3611_v18 = vld [vmem:[#allocation4 + $0x18] sm:$0xff]   ;;  %v3614_v21 = vld [vmem:[#allocation4 + $0xd0] sm:$0xff]  }
  0x2b   :  { %3208 = vmatpush3.bf16.msra.mxu0 %v3599_v6  ;;  %v3608_v15 = vld [vmem:[#allocation4 + $0xa0] sm:$0xff]   ;;  %v3612_v19 = vld [vmem:[#allocation4 + $0x98] sm:$0xff]   ;;  %v3615_v22 = vld [vmem:[#allocation4 + $0x10] sm:$0xff]  }
  0x2c   :  { %3230 = vmatpush3.bf16.msra.mxu1 %v3600_v7  ;;  %3209 = vmatprep.subr.bf16.mxu0 %v3601_v8  ;;  %v3616_v23 = vld [vmem:[#allocation4 + $0x90] sm:$0xff]   ;;  %v3617_v24 = vld [vmem:[#allocation4 + $0x48] sm:$0xff]   ;;  %v3621_v28 = vld [vmem:[#allocation4 + $0x40] sm:$0xff]  }
  0x2d   :  { %3231 = vmatprep.subr.bf16.mxu1 %v3602_v9  ;;  %v3618_v25 = vld [vmem:[#allocation4 + $0xc8] sm:$0xff]   ;;  %v3622_v29 = vld [vmem:[#allocation4 + $0xc0] sm:$0xff]   ;;  %v63_v33 = vld [vmem:[#allocation2 + $0x18] sm:$0xff] }
  0x2e   :  { %v3619_v26 = vld [vmem:[#allocation4 + $0x8] sm:$0xff]   ;;  %v3623_v30 = vld [vmem:[#allocation4] sm:$0xff]   ;;  %v95_v36 = vpack.c.bf16 %v63_v33, %v63_v33  ;;  %v62_v38 = vld [vmem:[#allocation2 + $0x10] sm:$0xff] }
  0x2f   :  { %3210 = vmatpush3.bf16.msra.mxu0 %v3603_v10  ;;  %v3620_v27 = vld [vmem:[#allocation4 + $0x88] sm:$0xff]   ;;  %v3624_v31 = vld [vmem:[#allocation4 + $0x80] sm:$0xff]   ;;  %v94_v39 = vpack.c.bf16 %v62_v38, %v62_v38  ;;  %v3625_v40 = vld [vmem:[#allocation4 + $0x178] sm:$0xff]  }
  0x30   :  { %3232 = vmatpush3.bf16.msra.mxu1 %v3604_v11  ;;  %3211 = vmatprep.subr.bf16.mxu0 %v3605_v12  ;;  %v61_v32 = vld [vmem:[#allocation2 + $0x8] sm:$0xff]  ;;  %v60_v34 = vld [vmem:[#allocation2] sm:$0xff]  ;;  %v3626_v41 = vld [vmem:[#allocation4 + $0x1f8] sm:$0xff]  }
  0x31   :  { %3233 = vmatprep.subr.bf16.mxu1 %v3606_v13  ;;  %v93_v35 = vpack.c.bf16 %v61_v32, %v61_v32  ;;  %v92_v37 = vpack.c.bf16 %v60_v34, %v60_v34  ;;  %2251 = vmatprep.mubr.bf16.mxu1 %v95_v36  ;;  %v3627_v42 = vld [vmem:[#allocation4 + $0x138] sm:$0xff]   ;;  %v3629_v44 = vld [vmem:[#allocation4 + $0x170] sm:$0xff]   ;;  %v3633_v48 = vld [vmem:[#allocation4 + $0x168] sm:$0xff]  }
  0x32   :  { %v3628_v43 = vld [vmem:[#allocation4 + $0x1b8] sm:$0xff]   ;;  %v3630_v45 = vld [vmem:[#allocation4 + $0x1f0] sm:$0xff]   ;;  %v3634_v49 = vld [vmem:[#allocation4 + $0x1e8] sm:$0xff]  }
  0x33   :  { %3212 = vmatpush3.bf16.msra.mxu0 %v3607_v14  ;;  %2211 = vmatprep.mubr.bf16.mxu0 %v93_v35  ;;  %v3631_v46 = vld [vmem:[#allocation4 + $0x130] sm:$0xff]   ;;  %v3635_v50 = vld [vmem:[#allocation4 + $0x128] sm:$0xff]   ;;  %v3637_v52 = vld [vmem:[#allocation4 + $0x160] sm:$0xff]  }
  0x34   :  { %3234 = vmatpush3.bf16.msra.mxu1 %v3608_v15  ;;  %3213 = vmatprep.subr.bf16.mxu0 %v3609_v16  ;;  %v3632_v47 = vld [vmem:[#allocation4 + $0x1b0] sm:$0xff]   ;;  %v3636_v51 = vld [vmem:[#allocation4 + $0x1a8] sm:$0xff]   ;;  %v3638_v53 = vld [vmem:[#allocation4 + $0x1e0] sm:$0xff]  }
  0x35   :  { %3235 = vmatprep.subr.bf16.mxu1 %v3610_v17  ;;  %v3639_v54 = vld [vmem:[#allocation4 + $0x120] sm:$0xff]   ;;  %v3641_v56 = vld [vmem:[#allocation4 + $0x158] sm:$0xff]   ;;  %v3645_v60 = vld [vmem:[#allocation4 + $0x150] sm:$0xff]  }
  0x36   :  { %v3640_v55 = vld [vmem:[#allocation4 + $0x1a0] sm:$0xff]   ;;  %v3642_v57 = vld [vmem:[#allocation4 + $0x1d8] sm:$0xff]   ;;  %v3646_v61 = vld [vmem:[#allocation4 + $0x1d0] sm:$0xff]  }
  0x37   :  { %3214 = vmatpush3.bf16.msra.mxu0 %v3611_v18  ;;  %v3643_v58 = vld [vmem:[#allocation4 + $0x118] sm:$0xff]   ;;  %v3647_v62 = vld [vmem:[#allocation4 + $0x110] sm:$0xff]   ;;  %v3649_v0 = vld [vmem:[#allocation4 + $0x148] sm:$0xff]  }
  0x38   :  { %3236 = vmatpush3.bf16.msra.mxu1 %v3612_v19  ;;  %3215 = vmatprep.subr.bf16.mxu0 %v3613_v20  ;;  %v3644_v59 = vld [vmem:[#allocation4 + $0x198] sm:$0xff]   ;;  %v3648_v63 = vld [vmem:[#allocation4 + $0x190] sm:$0xff]   ;;  %v3650_v1 = vld [vmem:[#allocation4 + $0x1c8] sm:$0xff]  }
  0x39   :  { %3237 = vmatprep.subr.bf16.mxu1 %v3614_v21  ;;  %v3651_v2 = vld [vmem:[#allocation4 + $0x108] sm:$0xff]   ;;  %v3653_v4 = vld [vmem:[#allocation4 + $0x140] sm:$0xff]   ;;  %v67_v9 = vld [vmem:[#allocation2 + $0x38] sm:$0xff] }
  0x3a   :  { %v3652_v3 = vld [vmem:[#allocation4 + $0x188] sm:$0xff]   ;;  %v3654_v5 = vld [vmem:[#allocation4 + $0x1c0] sm:$0xff]   ;;  %v99_v11 = vpack.c.bf16 %v67_v9, %v67_v9  ;;  %v66_v13 = vld [vmem:[#allocation2 + $0x30] sm:$0xff] }
  0x3b   :  { %3216 = vmatpush3.bf16.msra.mxu0 %v3615_v22  ;;  %v3655_v6 = vld [vmem:[#allocation4 + $0x100] sm:$0xff]   ;;  %v65_v8 = vld [vmem:[#allocation2 + $0x28] sm:$0xff]  ;;  %v98_v15 = vpack.c.bf16 %v66_v13, %v66_v13  ;;  %v3657_v16 = vld [vmem:[#allocation4 + $0x278] sm:$0xff]  }
  0x3c   :  { %3238 = vmatpush3.bf16.msra.mxu1 %v3616_v23  ;;  %3217 = vmatprep.subr.bf16.mxu0 %v3617_v24  ;;  %v3656_v7 = vld [vmem:[#allocation4 + $0x180] sm:$0xff]   ;;  %v97_v10 = vpack.c.bf16 %v65_v8, %v65_v8  ;;  %v3658_v17 = vld [vmem:[#allocation4 + $0x2f8] sm:$0xff]   ;;  %v3661_v20 = vld [vmem:[#allocation4 + $0x270] sm:$0xff]  }
  0x3d   :  { %3239 = vmatprep.subr.bf16.mxu1 %v3618_v25  ;;  %v64_v12 = vld [vmem:[#allocation2 + $0x20] sm:$0xff]  ;;  %v3659_v18 = vld [vmem:[#allocation4 + $0x238] sm:$0xff]   ;;  %v3662_v21 = vld [vmem:[#allocation4 + $0x2f0] sm:$0xff]  }
  0x3e   :  { %v96_v14 = vpack.c.bf16 %v64_v12, %v64_v12  ;;  %v3660_v19 = vld [vmem:[#allocation4 + $0x2b8] sm:$0xff]   ;;  %v3663_v22 = vld [vmem:[#allocation4 + $0x230] sm:$0xff]   ;;  %v3665_v24 = vld [vmem:[#allocation4 + $0x268] sm:$0xff]  }
  0x3f   :  { %3218 = vmatpush3.bf16.msra.mxu0 %v3619_v26  ;;  %v3664_v23 = vld [vmem:[#allocation4 + $0x2b0] sm:$0xff]   ;;  %v3666_v25 = vld [vmem:[#allocation4 + $0x2e8] sm:$0xff]   ;;  %v3673_v32 = vld [vmem:[#allocation4 + $0x258] sm:$0xff]  }
  0x40   :  { %3240 = vmatpush3.bf16.msra.mxu1 %v3620_v27  ;;  %3219 = vmatprep.subr.bf16.mxu0 %v3621_v28  ;;  %v3667_v26 = vld [vmem:[#allocation4 + $0x228] sm:$0xff]   ;;  %v3669_v28 = vld [vmem:[#allocation4 + $0x260] sm:$0xff]   ;;  %v3674_v33 = vld [vmem:[#allocation4 + $0x2d8] sm:$0xff]  }
  0x41   :  { %3241 = vmatprep.subr.bf16.mxu1 %v3622_v29  ;;  %v3668_v27 = vld [vmem:[#allocation4 + $0x2a8] sm:$0xff]   ;;  %v3670_v29 = vld [vmem:[#allocation4 + $0x2e0] sm:$0xff]   ;;  %v3675_v34 = vld [vmem:[#allocation4 + $0x218] sm:$0xff]  }
  0x42   :  { %v3676_v35 = vld [vmem:[#allocation4 + $0x298] sm:$0xff]   ;;  %v3677_v36 = vld [vmem:[#allocation4 + $0x250] sm:$0xff]  }
  0x43   :  { %3220 = vmatpush3.bf16.msra.mxu0 %v3623_v30  ;;  %v3671_v30 = vld [vmem:[#allocation4 + $0x220] sm:$0xff]   ;;  %v3679_v38 = vld [vmem:[#allocation4 + $0x210] sm:$0xff]   ;;  %v3705_v8 = vld [vmem:[#allocation4 + $0x358] sm:$0xff]  }
  0x44   :  { %3242 = vmatpush3.bf16.msra.mxu1 %v3624_v31  ;;  %3249 = vmatprep.subr.bf16.mxu0 %v3625_v40  ;;  %v3672_v31 = vld [vmem:[#allocation4 + $0x2a0] sm:$0xff]   ;;  %v3681_v40 = vld [vmem:[#allocation4 + $0x248] sm:$0xff]   ;;  %v3706_v9 = vld [vmem:[#allocation4 + $0x3d8] sm:$0xff]  }
  0x45   :  { %3271 = vmatprep.subr.bf16.mxu1 %v3626_v41  ;;  %v3682_v41 = vld [vmem:[#allocation4 + $0x2c8] sm:$0xff]   ;;  %v3709_v12 = vld [vmem:[#allocation4 + $0x350] sm:$0xff]  }
  0x46   :  { %2212 = vmatmul.mubr.bf16.vlgmr.msra.gmra.mxu0 %v92_v37  ;;  %v3678_v37 = vld [vmem:[#allocation4 + $0x2d0] sm:$0xff]  }
  0x47   :  { %2252 = vmatmul.mubr.bf16.vlgmr.msra.gmra.mxu1 %v94_v39  ;;  %3250 = vmatpush3.bf16.msra.mxu0 %v3627_v42  ;;  %v3680_v39 = vld [vmem:[#allocation4 + $0x290] sm:$0xff]   ;;  %v3683_v42 = vld [vmem:[#allocation4 + $0x208] sm:$0xff]  }
  0x48   :  { %3272 = vmatpush3.bf16.msra.mxu1 %v3628_v43  ;;  %3251 = vmatprep.subr.bf16.mxu0 %v3629_v44  ;;  %v3684_v43 = vld [vmem:[#allocation4 + $0x288] sm:$0xff]   ;;  %v3685_v44 = vld [vmem:[#allocation4 + $0x240] sm:$0xff]   ;;  %v3710_v13 = vld [vmem:[#allocation4 + $0x3d0] sm:$0xff]  }
  0x49   :  { %3273 = vmatprep.subr.bf16.mxu1 %v3630_v45  ;;  %2291 = vmatprep.mubr.bf16.mxu0 %v97_v10  ;;  %v3686_v45 = vld [vmem:[#allocation4 + $0x2c0] sm:$0xff]   ;;  %v3707_v10 = vld [vmem:[#allocation4 + $0x318] sm:$0xff]  }
  0x4a   :  { %2331 = vmatprep.mubr.bf16.mxu1 %v99_v11  ;;  %v3708_v11 = vld [vmem:[#allocation4 + $0x398] sm:$0xff]  }
  0x4b   :  { %3252 = vmatpush3.bf16.msra.mxu0 %v3631_v46  ;;  %v3687_v46 = vld [vmem:[#allocation4 + $0x200] sm:$0xff]  }
  0x4c   :  { %3274 = vmatpush3.bf16.msra.mxu1 %v3632_v47  ;;  %3253 = vmatprep.subr.bf16.mxu0 %v3633_v48  ;;  %v3688_v47 = vld [vmem:[#allocation4 + $0x280] sm:$0xff]   ;;  %v69_v48 = vld [vmem:[#allocation2 + $0x48] sm:$0xff] }
  0x4d   :  { %3275 = vmatprep.subr.bf16.mxu1 %v3634_v49  ;;  %v101_v49 = vpack.c.bf16 %v69_v48, %v69_v48  ;;  %v3737_v48 = vld [vmem:[#allocation4 + $0x458] sm:$0xff]  }
  0x4f   :  { %3254 = vmatpush3.bf16.msra.mxu0 %v3635_v50  ;;  %v71_v50 = vld [vmem:[#allocation2 + $0x58] sm:$0xff] }
  0x50   :  { %3276 = vmatpush3.bf16.msra.mxu1 %v3636_v51  ;;  %3255 = vmatprep.subr.bf16.mxu0 %v3637_v52  ;;  %v68_v51 = vld [vmem:[#allocation2 + $0x40] sm:$0xff]  ;;  %v70_v52 = vld [vmem:[#allocation2 + $0x50] sm:$0xff] }
  0x51   :  { %3277 = vmatprep.subr.bf16.mxu1 %v3638_v53  ;;  %v103_v53 = vpack.c.bf16 %v71_v50, %v71_v50  ;;  %v3739_v50 = vld [vmem:[#allocation4 + $0x418] sm:$0xff]  }
  0x53   :  { %3256 = vmatpush3.bf16.msra.mxu0 %v3639_v54  ;;  %v100_v54 = vpack.c.bf16 %v68_v51, %v68_v51  ;;  %v3740_v51 = vld [vmem:[#allocation4 + $0x498] sm:$0xff]  }
  0x54   :  { %3278 = vmatpush3.bf16.msra.mxu1 %v3640_v55  ;;  %3257 = vmatprep.subr.bf16.mxu0 %v3641_v56  ;;  %v102_v55 = vpack.c.bf16 %v70_v52, %v70_v52  ;;  %v3689_v56 = vld [vmem:[#allocation4 + $0x378] sm:$0xff]   ;;  %v3741_v52 = vld [vmem:[#allocation4 + $0x450] sm:$0xff]  }
  0x55   :  { %3279 = vmatprep.subr.bf16.mxu1 %v3642_v57  ;;  %v3690_v57 = vld [vmem:[#allocation4 + $0x3f8] sm:$0xff]  }
  0x57   :  { %3258 = vmatpush3.bf16.msra.mxu0 %v3643_v58  ;;  %v3691_v58 = vld [vmem:[#allocation4 + $0x338] sm:$0xff]  }
  0x58   :  { %3280 = vmatpush3.bf16.msra.mxu1 %v3644_v59  ;;  %3259 = vmatprep.subr.bf16.mxu0 %v3645_v60  ;;  %v3692_v59 = vld [vmem:[#allocation4 + $0x3b8] sm:$0xff]   ;;  %v3693_v60 = vld [vmem:[#allocation4 + $0x370] sm:$0xff]  }
  0x59   :  { %3281 = vmatprep.subr.bf16.mxu1 %v3646_v61  ;;  %v3694_v61 = vld [vmem:[#allocation4 + $0x3f0] sm:$0xff]  }
  0x5b   :  { %3260 = vmatpush3.bf16.msra.mxu0 %v3647_v62  ;;  %v3695_v62 = vld [vmem:[#allocation4 + $0x330] sm:$0xff]  }
  0x5c   :  { %3282 = vmatpush3.bf16.msra.mxu1 %v3648_v63  ;;  %3261 = vmatprep.subr.bf16.mxu0 %v3649_v0  ;;  %v3696_v63 = vld [vmem:[#allocation4 + $0x3b0] sm:$0xff]   ;;  %v3697_v0 = vld [vmem:[#allocation4 + $0x368] sm:$0xff]  }
  0x5d   :  { %3283 = vmatprep.subr.bf16.mxu1 %v3650_v1  ;;  %v3698_v1 = vld [vmem:[#allocation4 + $0x3e8] sm:$0xff]  }
  0x5f   :  { %3262 = vmatpush3.bf16.msra.mxu0 %v3651_v2  ;;  %v3699_v2 = vld [vmem:[#allocation4 + $0x328] sm:$0xff]  }
  0x60   :  { %3284 = vmatpush3.bf16.msra.mxu1 %v3652_v3  ;;  %3263 = vmatprep.subr.bf16.mxu0 %v3653_v4  ;;  %v3700_v3 = vld [vmem:[#allocation4 + $0x3a8] sm:$0xff]   ;;  %v3701_v4 = vld [vmem:[#allocation4 + $0x360] sm:$0xff]  }
  0x61   :  { %3285 = vmatprep.subr.bf16.mxu1 %v3654_v5  ;;  %v3702_v5 = vld [vmem:[#allocation4 + $0x3e0] sm:$0xff]  }
  0x63   :  { %3264 = vmatpush3.bf16.msra.mxu0 %v3655_v6  ;;  %v3703_v6 = vld [vmem:[#allocation4 + $0x320] sm:$0xff]  }
  0x64   :  { %3286 = vmatpush3.bf16.msra.mxu1 %v3656_v7  ;;  %3293 = vmatprep.subr.bf16.mxu0 %v3657_v16  ;;  %v3704_v7 = vld [vmem:[#allocation4 + $0x3a0] sm:$0xff]   ;;  %v3713_v16 = vld [vmem:[#allocation4 + $0x348] sm:$0xff]  }
  0x65   :  { %3315 = vmatprep.subr.bf16.mxu1 %v3658_v17  ;;  %v3714_v17 = vld [vmem:[#allocation4 + $0x3c8] sm:$0xff]  }
  0x66   :  { %2292 = vmatmul.mubr.bf16.vlgmr.msra.gmra.mxu0 %v96_v14  ;;  %v3711_v14 = vld [vmem:[#allocation4 + $0x310] sm:$0xff]  }
  0x67   :  { %2332 = vmatmul.mubr.bf16.vlgmr.msra.gmra.mxu1 %v98_v15  ;;  %3294 = vmatpush3.bf16.msra.mxu0 %v3659_v18  ;;  %v3712_v15 = vld [vmem:[#allocation4 + $0x390] sm:$0xff]   ;;  %v3715_v18 = vld [vmem:[#allocation4 + $0x308] sm:$0xff]  }
  0x68   :  { %3316 = vmatpush3.bf16.msra.mxu1 %v3660_v19  ;;  %3295 = vmatprep.subr.bf16.mxu0 %v3661_v20  ;;  %v3716_v19 = vld [vmem:[#allocation4 + $0x388] sm:$0xff]   ;;  %v3717_v20 = vld [vmem:[#allocation4 + $0x340] sm:$0xff]  }
  0x69   :  { %3317 = vmatprep.subr.bf16.mxu1 %v3662_v21  ;;  %2371 = vmatprep.mubr.bf16.mxu0 %v101_v49  ;;  %v3718_v21 = vld [vmem:[#allocation4 + $0x3c0] sm:$0xff]   ;;  %v3738_v49 = vld [vmem:[#allocation4 + $0x4d8] sm:$0xff]  }
  0x6a   :  { %2411 = vmatprep.mubr.bf16.mxu1 %v103_v53  ;;  %v3742_v53 = vld [vmem:[#allocation4 + $0x4d0] sm:$0xff]  }
  0x6b   :  { %3296 = vmatpush3.bf16.msra.mxu0 %v3663_v22  ;;  %v3719_v22 = vld [vmem:[#allocation4 + $0x300] sm:$0xff]  }
  0x6c   :  { %3318 = vmatpush3.bf16.msra.mxu1 %v3664_v23  ;;  %3297 = vmatprep.subr.bf16.mxu0 %v3665_v24  ;;  %v3720_v23 = vld [vmem:[#allocation4 + $0x380] sm:$0xff]   ;;  %v73_v24 = vld [vmem:[#allocation2 + $0x68] sm:$0xff] }
  0x6d   :  { %3319 = vmatprep.subr.bf16.mxu1 %v3666_v25  ;;  %v75_v25 = vld [vmem:[#allocation2 + $0x78] sm:$0xff] }
  0x6f   :  { %3298 = vmatpush3.bf16.msra.mxu0 %v3667_v26  ;;  %v72_v26 = vld [vmem:[#allocation2 + $0x60] sm:$0xff] }
  0x70   :  { %3320 = vmatpush3.bf16.msra.mxu1 %v3668_v27  ;;  %3299 = vmatprep.subr.bf16.mxu0 %v3669_v28  ;;  %v105_v27 = vpack.c.bf16 %v73_v24, %v73_v24  ;;  %v107_v28 = vpack.c.bf16 %v75_v25, %v75_v25  ;;  %v3769_v24 = vld [vmem:[#allocation4 + $0x558] sm:$0xff]  }
  0x71   :  { %3321 = vmatprep.subr.bf16.mxu1 %v3670_v29  ;;  %v104_v29 = vpack.c.bf16 %v72_v26, %v72_v26  ;;  %v3770_v25 = vld [vmem:[#allocation4 + $0x5d8] sm:$0xff]  }
  0x72   :  { %v3771_v26 = vld [vmem:[#allocation4 + $0x518] sm:$0xff]  }
  0x73   :  { %3300 = vmatpush3.bf16.msra.mxu0 %v3671_v30  ;;  %v74_v30 = vld [vmem:[#allocation2 + $0x70] sm:$0xff] }
  0x74   :  { %3322 = vmatpush3.bf16.msra.mxu1 %v3672_v31  ;;  %3301 = vmatprep.subr.bf16.mxu0 %v3673_v32  ;;  %v106_v31 = vpack.c.bf16 %v74_v30, %v74_v30  ;;  %v3721_v32 = vld [vmem:[#allocation4 + $0x478] sm:$0xff]   ;;  %v3775_v30 = vld [vmem:[#allocation4 + $0x510] sm:$0xff]  }
  0x75   :  { %3323 = vmatprep.subr.bf16.mxu1 %v3674_v33  ;;  %v3722_v33 = vld [vmem:[#allocation4 + $0x4f8] sm:$0xff]  }
  0x77   :  { %3302 = vmatpush3.bf16.msra.mxu0 %v3675_v34  ;;  %v3723_v34 = vld [vmem:[#allocation4 + $0x438] sm:$0xff]  }
  0x78   :  { %3324 = vmatpush3.bf16.msra.mxu1 %v3676_v35  ;;  %3303 = vmatprep.subr.bf16.mxu0 %v3677_v36  ;;  %v3724_v35 = vld [vmem:[#allocation4 + $0x4b8] sm:$0xff]   ;;  %v3725_v36 = vld [vmem:[#allocation4 + $0x470] sm:$0xff]  }
  0x79   :  { %3325 = vmatprep.subr.bf16.mxu1 %v3678_v37  ;;  %v3726_v37 = vld [vmem:[#allocation4 + $0x4f0] sm:$0xff]  }
  0x7b   :  { %3304 = vmatpush3.bf16.msra.mxu0 %v3679_v38  ;;  %v3727_v38 = vld [vmem:[#allocation4 + $0x430] sm:$0xff]  }
  0x7c   :  { %3326 = vmatpush3.bf16.msra.mxu1 %v3680_v39  ;;  %3305 = vmatprep.subr.bf16.mxu0 %v3681_v40  ;;  %v3728_v39 = vld [vmem:[#allocation4 + $0x4b0] sm:$0xff]   ;;  %v3729_v40 = vld [vmem:[#allocation4 + $0x468] sm:$0xff]  }
  0x7d   :  { %3327 = vmatprep.subr.bf16.mxu1 %v3682_v41  ;;  %v3730_v41 = vld [vmem:[#allocation4 + $0x4e8] sm:$0xff]  }
  0x7f   :  { %3306 = vmatpush3.bf16.msra.mxu0 %v3683_v42  ;;  %v3731_v42 = vld [vmem:[#allocation4 + $0x428] sm:$0xff]  }
  0x80   :  { %3328 = vmatpush3.bf16.msra.mxu1 %v3684_v43  ;;  %3307 = vmatprep.subr.bf16.mxu0 %v3685_v44  ;;  %v3732_v43 = vld [vmem:[#allocation4 + $0x4a8] sm:$0xff]   ;;  %v3733_v44 = vld [vmem:[#allocation4 + $0x460] sm:$0xff]  }
  0x81   :  { %3329 = vmatprep.subr.bf16.mxu1 %v3686_v45  ;;  %v3734_v45 = vld [vmem:[#allocation4 + $0x4e0] sm:$0xff]  }
  0x83   :  { %3308 = vmatpush3.bf16.msra.mxu0 %v3687_v46  ;;  %v3735_v46 = vld [vmem:[#allocation4 + $0x420] sm:$0xff]  }
  0x84   :  { %3330 = vmatpush3.bf16.msra.mxu1 %v3688_v47  ;;  %3337 = vmatprep.subr.bf16.mxu0 %v3689_v56  ;;  %v3736_v47 = vld [vmem:[#allocation4 + $0x4a0] sm:$0xff]   ;;  %v3745_v56 = vld [vmem:[#allocation4 + $0x448] sm:$0xff]  }
  0x85   :  { %3359 = vmatprep.subr.bf16.mxu1 %v3690_v57  ;;  %v3746_v57 = vld [vmem:[#allocation4 + $0x4c8] sm:$0xff]  }
  0x86   :  { %2372 = vmatmul.mubr.bf16.vlgmr.msra.gmra.mxu0 %v100_v54  ;;  %v3743_v54 = vld [vmem:[#allocation4 + $0x410] sm:$0xff]  }
  0x87   :  { %2412 = vmatmul.mubr.bf16.vlgmr.msra.gmra.mxu1 %v102_v55  ;;  %3338 = vmatpush3.bf16.msra.mxu0 %v3691_v58  ;;  %v3744_v55 = vld [vmem:[#allocation4 + $0x490] sm:$0xff]   ;;  %v3747_v58 = vld [vmem:[#allocation4 + $0x408] sm:$0xff]  }
  0x88   :  { %3360 = vmatpush3.bf16.msra.mxu1 %v3692_v59  ;;  %3339 = vmatprep.subr.bf16.mxu0 %v3693_v60  ;;  %v3748_v59 = vld [vmem:[#allocation4 + $0x488] sm:$0xff]   ;;  %v3749_v60 = vld [vmem:[#allocation4 + $0x440] sm:$0xff]  }
  0x89   :  { %3361 = vmatprep.subr.bf16.mxu1 %v3694_v61  ;;  %2451 = vmatprep.mubr.bf16.mxu0 %v105_v27  ;;  %v3750_v61 = vld [vmem:[#allocation4 + $0x4c0] sm:$0xff]   ;;  %v3772_v27 = vld [vmem:[#allocation4 + $0x598] sm:$0xff]  }
  0x8a   :  { %2491 = vmatprep.mubr.bf16.mxu1 %v107_v28  ;;  %v3773_v28 = vld [vmem:[#allocation4 + $0x550] sm:$0xff]  }
  0x8b   :  { %3340 = vmatpush3.bf16.msra.mxu0 %v3695_v62  ;;  %v3751_v62 = vld [vmem:[#allocation4 + $0x400] sm:$0xff]  }
  0x8c   :  { %3362 = vmatpush3.bf16.msra.mxu1 %v3696_v63  ;;  %3341 = vmatprep.subr.bf16.mxu0 %v3697_v0  ;;  %v3752_v63 = vld [vmem:[#allocation4 + $0x480] sm:$0xff]   ;;  %v77_v0 = vld [vmem:[#allocation2 + $0x88] sm:$0xff] }
  0x8d   :  { %3363 = vmatprep.subr.bf16.mxu1 %v3698_v1  ;;  %v79_v1 = vld [vmem:[#allocation2 + $0x98] sm:$0xff] }
  0x8f   :  { %3342 = vmatpush3.bf16.msra.mxu0 %v3699_v2  ;;  %v109_v2 = vpack.c.bf16 %v77_v0, %v77_v0  ;;  %v3801_v0 = vld [vmem:[#allocation4 + $0x658] sm:$0xff]  }
  0x90   :  { %3364 = vmatpush3.bf16.msra.mxu1 %v3700_v3  ;;  %3343 = vmatprep.subr.bf16.mxu0 %v3701_v4  ;;  %v111_v3 = vpack.c.bf16 %v79_v1, %v79_v1  ;;  %v76_v4 = vld [vmem:[#allocation2 + $0x80] sm:$0xff]  ;;  %v3802_v1 = vld [vmem:[#allocation4 + $0x6d8] sm:$0xff]  }
  0x91   :  { %3365 = vmatprep.subr.bf16.mxu1 %v3702_v5  ;;  %v78_v5 = vld [vmem:[#allocation2 + $0x90] sm:$0xff] }
  0x93   :  { %3344 = vmatpush3.bf16.msra.mxu0 %v3703_v6  ;;  %v108_v6 = vpack.c.bf16 %v76_v4, %v76_v4  ;;  %v3805_v4 = vld [vmem:[#allocation4 + $0x650] sm:$0xff]  }
  0x94   :  { %3366 = vmatpush3.bf16.msra.mxu1 %v3704_v7  ;;  %3345 = vmatprep.subr.bf16.mxu0 %v3705_v8  ;;  %v110_v7 = vpack.c.bf16 %v78_v5, %v78_v5  ;;  %v3753_v8 = vld [vmem:[#allocation4 + $0x578] sm:$0xff]   ;;  %v3806_v5 = vld [vmem:[#allocation4 + $0x6d0] sm:$0xff]  }
  0x95   :  { %3367 = vmatprep.subr.bf16.mxu1 %v3706_v9  ;;  %v3754_v9 = vld [vmem:[#allocation4 + $0x5f8] sm:$0xff]  }
  0x97   :  { %3346 = vmatpush3.bf16.msra.mxu0 %v3707_v10  ;;  %v3755_v10 = vld [vmem:[#allocation4 + $0x538] sm:$0xff]  }
  0x98   :  { %3368 = vmatpush3.bf16.msra.mxu1 %v3708_v11  ;;  %3347 = vmatprep.subr.bf16.mxu0 %v3709_v12  ;;  %v3756_v11 = vld [vmem:[#allocation4 + $0x5b8] sm:$0xff]   ;;  %v3757_v12 = vld [vmem:[#allocation4 + $0x570] sm:$0xff]  }
  0x99   :  { %3369 = vmatprep.subr.bf16.mxu1 %v3710_v13  ;;  %v3758_v13 = vld [vmem:[#allocation4 + $0x5f0] sm:$0xff]  }
  0x9b   :  { %3348 = vmatpush3.bf16.msra.mxu0 %v3711_v14  ;;  %v3759_v14 = vld [vmem:[#allocation4 + $0x530] sm:$0xff]  }
  0x9c   :  { %3370 = vmatpush3.bf16.msra.mxu1 %v3712_v15  ;;  %3349 = vmatprep.subr.bf16.mxu0 %v3713_v16  ;;  %v3760_v15 = vld [vmem:[#allocation4 + $0x5b0] sm:$0xff]   ;;  %v3761_v16 = vld [vmem:[#allocation4 + $0x568] sm:$0xff]  }
  0x9d   :  { %3371 = vmatprep.subr.bf16.mxu1 %v3714_v17  ;;  %v3762_v17 = vld [vmem:[#allocation4 + $0x5e8] sm:$0xff]  }
  0x9f   :  { %3350 = vmatpush3.bf16.msra.mxu0 %v3715_v18  ;;  %v3763_v18 = vld [vmem:[#allocation4 + $0x528] sm:$0xff]  }
  0xa0   :  { %3372 = vmatpush3.bf16.msra.mxu1 %v3716_v19  ;;  %3351 = vmatprep.subr.bf16.mxu0 %v3717_v20  ;;  %v3764_v19 = vld [vmem:[#allocation4 + $0x5a8] sm:$0xff]   ;;  %v3765_v20 = vld [vmem:[#allocation4 + $0x560] sm:$0xff]  }
  0xa1   :  { %3373 = vmatprep.subr.bf16.mxu1 %v3718_v21  ;;  %v3766_v21 = vld [vmem:[#allocation4 + $0x5e0] sm:$0xff]  }
  0xa3   :  { %3352 = vmatpush3.bf16.msra.mxu0 %v3719_v22  ;;  %v3767_v22 = vld [vmem:[#allocation4 + $0x520] sm:$0xff]  }
  0xa4   :  { %3374 = vmatpush3.bf16.msra.mxu1 %v3720_v23  ;;  %3381 = vmatprep.subr.bf16.mxu0 %v3721_v32  ;;  %v3768_v23 = vld [vmem:[#allocation4 + $0x5a0] sm:$0xff]   ;;  %v3777_v32 = vld [vmem:[#allocation4 + $0x548] sm:$0xff]  }
  0xa5   :  { %3403 = vmatprep.subr.bf16.mxu1 %v3722_v33  ;;  %v3778_v33 = vld [vmem:[#allocation4 + $0x5c8] sm:$0xff]  }
  0xa6   :  { %2452 = vmatmul.mubr.bf16.vlgmr.msra.gmra.mxu0 %v104_v29  ;;  %v3774_v29 = vld [vmem:[#allocation4 + $0x5d0] sm:$0xff]  }
  0xa7   :  { %2492 = vmatmul.mubr.bf16.vlgmr.msra.gmra.mxu1 %v106_v31  ;;  %3382 = vmatpush3.bf16.msra.mxu0 %v3723_v34  ;;  %v3776_v31 = vld [vmem:[#allocation4 + $0x590] sm:$0xff]   ;;  %v3779_v34 = vld [vmem:[#allocation4 + $0x508] sm:$0xff]  }
  0xa8   :  { %3404 = vmatpush3.bf16.msra.mxu1 %v3724_v35  ;;  %3383 = vmatprep.subr.bf16.mxu0 %v3725_v36  ;;  %v3780_v35 = vld [vmem:[#allocation4 + $0x588] sm:$0xff]   ;;  %v3781_v36 = vld [vmem:[#allocation4 + $0x540] sm:$0xff]  }
  0xa9   :  { %3405 = vmatprep.subr.bf16.mxu1 %v3726_v37  ;;  %2531 = vmatprep.mubr.bf16.mxu0 %v109_v2  ;;  %v3782_v37 = vld [vmem:[#allocation4 + $0x5c0] sm:$0xff]   ;;  %v3803_v2 = vld [vmem:[#allocation4 + $0x618] sm:$0xff]  }
  0xaa   :  { %2571 = vmatprep.mubr.bf16.mxu1 %v111_v3  ;;  %v3804_v3 = vld [vmem:[#allocation4 + $0x698] sm:$0xff]  }
  0xab   :  { %3384 = vmatpush3.bf16.msra.mxu0 %v3727_v38  ;;  %v3783_v38 = vld [vmem:[#allocation4 + $0x500] sm:$0xff]  }
  0xac   :  { %3406 = vmatpush3.bf16.msra.mxu1 %v3728_v39  ;;  %3385 = vmatprep.subr.bf16.mxu0 %v3729_v40  ;;  %v3784_v39 = vld [vmem:[#allocation4 + $0x580] sm:$0xff]   ;;  %v81_v40 = vld [vmem:[#allocation2 + $0xa8] sm:$0xff] }
  0xad   :  { %3407 = vmatprep.subr.bf16.mxu1 %v3730_v41  ;;  %v113_v41 = vpack.c.bf16 %v81_v40, %v81_v40  ;;  %v3821_v40 = vld [vmem:[#allocation4 + $0x770] sm:$0xff]  }
  0xaf   :  { %3386 = vmatpush3.bf16.msra.mxu0 %v3731_v42  ;;  %v83_v42 = vld [vmem:[#allocation2 + $0xb8] sm:$0xff] }
  0xb0   :  { %3408 = vmatpush3.bf16.msra.mxu1 %v3732_v43  ;;  %3387 = vmatprep.subr.bf16.mxu0 %v3733_v44  ;;  %v80_v43 = vld [vmem:[#allocation2 + $0xa0] sm:$0xff]  ;;  %v82_v44 = vld [vmem:[#allocation2 + $0xb0] sm:$0xff] }
  0xb1   :  { %3409 = vmatprep.subr.bf16.mxu1 %v3734_v45  ;;  %v115_v45 = vpack.c.bf16 %v83_v42, %v83_v42 }
  0xb3   :  { %3388 = vmatpush3.bf16.msra.mxu0 %v3735_v46  ;;  %v112_v46 = vpack.c.bf16 %v80_v43, %v80_v43  ;;  %v3823_v43 = vld [vmem:[#allocation4 + $0x730] sm:$0xff]  }
  0xb4   :  { %3410 = vmatpush3.bf16.msra.mxu1 %v3736_v47  ;;  %3389 = vmatprep.subr.bf16.mxu0 %v3737_v48  ;;  %v114_v47 = vpack.c.bf16 %v82_v44, %v82_v44  ;;  %v3785_v48 = vld [vmem:[#allocation4 + $0x678] sm:$0xff]   ;;  %v3824_v44 = vld [vmem:[#allocation4 + $0x7b0] sm:$0xff]  }
  0xb5   :  { %3411 = vmatprep.subr.bf16.mxu1 %v3738_v49  ;;  %v3786_v49 = vld [vmem:[#allocation4 + $0x6f8] sm:$0xff]  }
  0xb7   :  { %3390 = vmatpush3.bf16.msra.mxu0 %v3739_v50  ;;  %v3787_v50 = vld [vmem:[#allocation4 + $0x638] sm:$0xff]  }
  0xb8   :  { %3412 = vmatpush3.bf16.msra.mxu1 %v3740_v51  ;;  %3391 = vmatprep.subr.bf16.mxu0 %v3741_v52  ;;  %v3788_v51 = vld [vmem:[#allocation4 + $0x6b8] sm:$0xff]   ;;  %v3789_v52 = vld [vmem:[#allocation4 + $0x670] sm:$0xff]  }
  0xb9   :  { %3413 = vmatprep.subr.bf16.mxu1 %v3742_v53  ;;  %v3790_v53 = vld [vmem:[#allocation4 + $0x6f0] sm:$0xff]  }
  0xbb   :  { %3392 = vmatpush3.bf16.msra.mxu0 %v3743_v54  ;;  %v3791_v54 = vld [vmem:[#allocation4 + $0x630] sm:$0xff]  }
  0xbc   :  { %3414 = vmatpush3.bf16.msra.mxu1 %v3744_v55  ;;  %3393 = vmatprep.subr.bf16.mxu0 %v3745_v56  ;;  %v3792_v55 = vld [vmem:[#allocation4 + $0x6b0] sm:$0xff]   ;;  %v3793_v56 = vld [vmem:[#allocation4 + $0x668] sm:$0xff]  }
  0xbd   :  { %3415 = vmatprep.subr.bf16.mxu1 %v3746_v57  ;;  %v3794_v57 = vld [vmem:[#allocation4 + $0x6e8] sm:$0xff]  }
  0xbf   :  { %3394 = vmatpush3.bf16.msra.mxu0 %v3747_v58  ;;  %v3795_v58 = vld [vmem:[#allocation4 + $0x628] sm:$0xff]  }
  0xc0   :  { %3416 = vmatpush3.bf16.msra.mxu1 %v3748_v59  ;;  %3395 = vmatprep.subr.bf16.mxu0 %v3749_v60  ;;  %v3796_v59 = vld [vmem:[#allocation4 + $0x6a8] sm:$0xff]   ;;  %v3797_v60 = vld [vmem:[#allocation4 + $0x660] sm:$0xff]  }
  0xc1   :  { %3417 = vmatprep.subr.bf16.mxu1 %v3750_v61  ;;  %v3798_v61 = vld [vmem:[#allocation4 + $0x6e0] sm:$0xff]  }
  0xc3   :  { %3396 = vmatpush3.bf16.msra.mxu0 %v3751_v62  ;;  %v3799_v62 = vld [vmem:[#allocation4 + $0x620] sm:$0xff]  }
  0xc4   :  { %3418 = vmatpush3.bf16.msra.mxu1 %v3752_v63  ;;  %3425 = vmatprep.subr.bf16.mxu0 %v3753_v8  ;;  %v3800_v63 = vld [vmem:[#allocation4 + $0x6a0] sm:$0xff]   ;;  %v3809_v8 = vld [vmem:[#allocation4 + $0x648] sm:$0xff]  }
  0xc5   :  { %3447 = vmatprep.subr.bf16.mxu1 %v3754_v9  ;;  %v3810_v9 = vld [vmem:[#allocation4 + $0x6c8] sm:$0xff]  }
  0xc6   :  { %2532 = vmatmul.mubr.bf16.vlgmr.msra.gmra.mxu0 %v108_v6  ;;  %v3807_v6 = vld [vmem:[#allocation4 + $0x610] sm:$0xff]  }
  0xc7   :  { %2572 = vmatmul.mubr.bf16.vlgmr.msra.gmra.mxu1 %v110_v7  ;;  %3426 = vmatpush3.bf16.msra.mxu0 %v3755_v10  ;;  %v3808_v7 = vld [vmem:[#allocation4 + $0x690] sm:$0xff]   ;;  %v3811_v10 = vld [vmem:[#allocation4 + $0x608] sm:$0xff]  }
  0xc8   :  { %3448 = vmatpush3.bf16.msra.mxu1 %v3756_v11  ;;  %3427 = vmatprep.subr.bf16.mxu0 %v3757_v12  ;;  %v3812_v11 = vld [vmem:[#allocation4 + $0x688] sm:$0xff]   ;;  %v3813_v12 = vld [vmem:[#allocation4 + $0x640] sm:$0xff]  }
  0xc9   :  { %3449 = vmatprep.subr.bf16.mxu1 %v3758_v13  ;;  %2611 = vmatprep.mubr.bf16.mxu0 %v113_v41  ;;  %v3822_v41 = vld [vmem:[#allocation4 + $0x7f0] sm:$0xff]  }
  0xca   :  { %2651 = vmatprep.mubr.bf16.mxu1 %v115_v45  ;;  %v3825_v45 = vld [vmem:[#allocation4 + $0x768] sm:$0xff]  }
  0xcb   :  { %3428 = vmatpush3.bf16.msra.mxu0 %v3759_v14 }
  0xcc   :  { %3450 = vmatpush3.bf16.msra.mxu1 %v3760_v15  ;;  %3429 = vmatprep.subr.bf16.mxu0 %v3761_v16  ;;  %v3814_v15 = vld [vmem:[#allocation4 + $0x6c0] sm:$0xff]  }
  0xcd   :  { %3451 = vmatprep.subr.bf16.mxu1 %v3762_v17  ;;  %v3815_v16 = vld [vmem:[#allocation4 + $0x600] sm:$0xff]  }
  0xcf   :  { %3430 = vmatpush3.bf16.msra.mxu0 %v3763_v18 }
  0xd0   :  { %3452 = vmatpush3.bf16.msra.mxu1 %v3764_v19  ;;  %3431 = vmatprep.subr.bf16.mxu0 %v3765_v20  ;;  %v3816_v19 = vld [vmem:[#allocation4 + $0x680] sm:$0xff]  }
  0xd1   :  { %3453 = vmatprep.subr.bf16.mxu1 %v3766_v21 }
  0xd3   :  { %3432 = vmatpush3.bf16.msra.mxu0 %v3767_v22  ;;  %v85_v22 = vld [vmem:[#allocation2 + $0xc8] sm:$0xff] }
  0xd4   :  { %3454 = vmatpush3.bf16.msra.mxu1 %v3768_v23  ;;  %3433 = vmatprep.subr.bf16.mxu0 %v3769_v24  ;;  %v87_v23 = vld [vmem:[#allocation2 + $0xd8] sm:$0xff]  ;;  %v84_v24 = vld [vmem:[#allocation2 + $0xc0] sm:$0xff] }
  0xd5   :  { %3455 = vmatprep.subr.bf16.mxu1 %v3770_v25 }
  0xd7   :  { %3434 = vmatpush3.bf16.msra.mxu0 %v3771_v26 }
  0xd8   :  { %3456 = vmatpush3.bf16.msra.mxu1 %v3772_v27  ;;  %3435 = vmatprep.subr.bf16.mxu0 %v3773_v28  ;;  %v117_v27 = vpack.c.bf16 %v85_v22, %v85_v22  ;;  %v119_v28 = vpack.c.bf16 %v87_v23, %v87_v23 }
  0xd9   :  { %3457 = vmatprep.subr.bf16.mxu1 %v3774_v29  ;;  %v116_v29 = vpack.c.bf16 %v84_v24, %v84_v24 }
  0xdb   :  { %3436 = vmatpush3.bf16.msra.mxu0 %v3775_v30  ;;  %v86_v30 = vld [vmem:[#allocation2 + $0xd0] sm:$0xff] }
  0xdc   :  { %3458 = vmatpush3.bf16.msra.mxu1 %v3776_v31  ;;  %3437 = vmatprep.subr.bf16.mxu0 %v3777_v32  ;;  %v118_v31 = vpack.c.bf16 %v86_v30, %v86_v30  ;;  %v3817_v32 = vld [vmem:[#allocation4 + $0x778] sm:$0xff]  }
  0xdd   :  { %3459 = vmatprep.subr.bf16.mxu1 %v3778_v33 }
  0xdf   :  { %3438 = vmatpush3.bf16.msra.mxu0 %v3779_v34 }
  0xe0   :  { %3460 = vmatpush3.bf16.msra.mxu1 %v3780_v35  ;;  %3439 = vmatprep.subr.bf16.mxu0 %v3781_v36  ;;  %v3818_v35 = vld [vmem:[#allocation4 + $0x7f8] sm:$0xff]  }
  0xe1   :  { %3461 = vmatprep.subr.bf16.mxu1 %v3782_v37  ;;  %v3819_v36 = vld [vmem:[#allocation4 + $0x738] sm:$0xff]  }
  0xe2   :  { %v3820_v37 = vld [vmem:[#allocation4 + $0x7b8] sm:$0xff]  }
  0xe3   :  { %3440 = vmatpush3.bf16.msra.mxu0 %v3783_v38  ;;  %v2939_v38 = vld [vmem:[%s3981_s2] ss:$0 sm:$0xff] }
  0xe4   :  { %3462 = vmatpush3.bf16.msra.mxu1 %v3784_v39  ;;  %3469 = vmatprep.subr.bf16.mxu0 %v3785_v48  ;;  %v3828_v48 = vld [vmem:[#allocation4 + $0x7a8] sm:$0xff]  }
  0xe5   :  { %3491 = vmatprep.subr.bf16.mxu1 %v3786_v49  ;;  %v3829_v49 = vld [vmem:[#allocation4 + $0x760] sm:$0xff]  }
  0xe6   :  { %2612 = vmatmul.mubr.bf16.vlgmr.msra.gmra.mxu0 %v112_v46  ;;  %v3826_v46 = vld [vmem:[#allocation4 + $0x7e8] sm:$0xff]  }
  0xe7   :  { %2652 = vmatmul.mubr.bf16.vlgmr.msra.gmra.mxu1 %v114_v47  ;;  %3470 = vmatpush3.bf16.msra.mxu0 %v3787_v50  ;;  %v3827_v47 = vld [vmem:[#allocation4 + $0x728] sm:$0xff]   ;;  %v3830_v50 = vld [vmem:[#allocation4 + $0x7e0] sm:$0xff]  }
  0xe8   :  { %3492 = vmatpush3.bf16.msra.mxu1 %v3788_v51  ;;  %3471 = vmatprep.subr.bf16.mxu0 %v3789_v52  ;;  %v3831_v51 = vld [vmem:[#allocation4 + $0x720] sm:$0xff]  }
  0xe9   :  { %3493 = vmatprep.subr.bf16.mxu1 %v3790_v53  ;;  %2691 = vmatprep.mubr.bf16.mxu0 %v117_v27  ;;  %v3832_v52 = vld [vmem:[#allocation4 + $0x7a0] sm:$0xff]   ;;  %v3833_v53 = vld [vmem:[#allocation4 + $0x758] sm:$0xff]  }
  0xea   :  { %2731 = vmatprep.mubr.bf16.mxu1 %v119_v28 }
  0xeb   :  { %3472 = vmatpush3.bf16.msra.mxu0 %v3791_v54  ;;  %v3834_v54 = vld [vmem:[#allocation4 + $0x7d8] sm:$0xff]  }
  0xec   :  { %3494 = vmatpush3.bf16.msra.mxu1 %v3792_v55  ;;  %3473 = vmatprep.subr.bf16.mxu0 %v3793_v56  ;;  %v3835_v55 = vld [vmem:[#allocation4 + $0x718] sm:$0xff]  }
  0xed   :  { %3495 = vmatprep.subr.bf16.mxu1 %v3794_v57  ;;  %v3836_v56 = vld [vmem:[#allocation4 + $0x798] sm:$0xff]   ;;  %v3837_v57 = vld [vmem:[#allocation4 + $0x750] sm:$0xff]  }
  0xef   :  { %3474 = vmatpush3.bf16.msra.mxu0 %v3795_v58  ;;  %v3838_v58 = vld [vmem:[#allocation4 + $0x7d0] sm:$0xff]  }
  0xf0   :  { %3496 = vmatpush3.bf16.msra.mxu1 %v3796_v59  ;;  %3475 = vmatprep.subr.bf16.mxu0 %v3797_v60  ;;  %v3839_v59 = vld [vmem:[#allocation4 + $0x710] sm:$0xff]  }
  0xf1   :  { %3497 = vmatprep.subr.bf16.mxu1 %v3798_v61  ;;  %v3840_v60 = vld [vmem:[#allocation4 + $0x790] sm:$0xff]   ;;  %v3841_v61 = vld [vmem:[#allocation4 + $0x748] sm:$0xff]  }
  0xf3   :  { %3476 = vmatpush3.bf16.msra.mxu0 %v3799_v62  ;;  %v3842_v62 = vld [vmem:[#allocation4 + $0x7c8] sm:$0xff]  }
  0xf4   :  { %3498 = vmatpush3.bf16.msra.mxu1 %v3800_v63  ;;  %3477 = vmatprep.subr.bf16.mxu0 %v3801_v0  ;;  %v3843_v63 = vld [vmem:[#allocation4 + $0x708] sm:$0xff]  }
  0xf5   :  { %3499 = vmatprep.subr.bf16.mxu1 %v3802_v1  ;;  %v3844_v0 = vld [vmem:[#allocation4 + $0x788] sm:$0xff]  }
  0xf7   :  { %3478 = vmatpush3.bf16.msra.mxu0 %v3803_v2  ;;  %v3845_v2 = vld [vmem:[#allocation4 + $0x740] sm:$0xff]  }
  0xf8   :  { %3500 = vmatpush3.bf16.msra.mxu1 %v3804_v3  ;;  %3479 = vmatprep.subr.bf16.mxu0 %v3805_v4  ;;  %v3846_v4 = vld [vmem:[#allocation4 + $0x7c0] sm:$0xff]  }
  0xf9   :  { %3501 = vmatprep.subr.bf16.mxu1 %v3806_v5 }
  0xfb   :  { %3480 = vmatpush3.bf16.msra.mxu0 %v3807_v6  ;;  %v3847_v6 = vld [vmem:[#allocation4 + $0x700] sm:$0xff]  }
  0xfc   :  { %3502 = vmatpush3.bf16.msra.mxu1 %v3808_v7  ;;  %3481 = vmatprep.subr.bf16.mxu0 %v3809_v8 }
  0xfd   :  { %3503 = vmatprep.subr.bf16.mxu1 %v3810_v9  ;;  %v3848_v9 = vld [vmem:[#allocation4 + $0x780] sm:$0xff]  }
  0xff   :  { %3482 = vmatpush3.bf16.msra.mxu0 %v3811_v10  ;;  %v89_v10 = vld [vmem:[#allocation2 + $0xe8] sm:$0xff] }
 0x100   :  { %3504 = vmatpush3.bf16.msra.mxu1 %v3812_v11  ;;  %3483 = vmatprep.subr.bf16.mxu0 %v3813_v12 }
 0x101   :  { %3505 = vmatprep.subr.bf16.mxu1 %v3814_v15  ;;  %v88_v15 = vld [vmem:[#allocation2 + $0xe0] sm:$0xff] }
 0x103   :  { %3484 = vmatpush3.bf16.msra.mxu0 %v3815_v16  ;;  %v90_v16 = vld [vmem:[#allocation2 + $0xf0] sm:$0xff] }
 0x104   :  { %3506 = vmatpush3.bf16.msra.mxu1 %v3816_v19  ;;  %3513 = vmatprep.subr.bf16.mxu0 %v3817_v32 }
 0x105   :  { %3535 = vmatprep.subr.bf16.mxu1 %v3818_v35 }
 0x106   :  { %v3221_v13 = vpop.f32.mrf.mxu0  ;;  %2692 = vmatmul.mubr.bf16.vlgmr.msra.gmra.mxu0 %v116_v29 }
 0x107   :  { %v3243_v14 = vpop.f32.mrf.mxu1  ;;  %2732 = vmatmul.mubr.bf16.vlgmr.msra.gmra.mxu1 %v118_v31  ;;  %3514 = vmatpush3.bf16.msra.mxu0 %v3819_v36 }
 0x108   :  { %v3222_v17 = vpop.f32.mrf.mxu0  ;;  %3536 = vmatpush3.bf16.msra.mxu1 %v3820_v37  ;;  %3515 = vmatprep.subr.bf16.mxu0 %v3821_v40  ;;  %v3849_v37 = vld [vmem:[#allocation6 + $0x38] sm:$0xff]   ;;  %v3851_v40 = vld [vmem:[#allocation6 + $0x28] sm:$0xff]  }
 0x109   :  { %v3244_v18 = vpop.f32.mrf.mxu1  ;;  %v3223_v20 = vadd.f32 %v3222_v17, %v3221_v13  ;;  %3537 = vmatprep.subr.bf16.mxu1 %v3822_v41  ;;  %v121_v13 = vpack.c.bf16 %v89_v10, %v89_v10  ;;  %v3852_v41 = vld [vmem:[#allocation6 + $0x20] sm:$0xff]  }
 0x10a   :  { %v3245_v21 = vadd.f32 %v3244_v18, %v3243_v14  ;;  %v3224_v25 = vpop.f32.mrf.mxu0  ;;  %v91_v14 = vld [vmem:[#allocation2 + $0xf8] sm:$0xff] }
 0x10b   :  { %v3246_v26 = vpop.f32.mrf.mxu1  ;;  %v2214_v39 = vadd.f32 %v3223_v20, %v2939_v38  ;;  %3516 = vmatpush3.bf16.msra.mxu0 %v3823_v43  ;;  %v123_v19 = vpack.c.bf16 %v91_v14, %v91_v14  ;;  %v120_v20 = vpack.c.bf16 %v88_v15, %v88_v15  ;;  %2771 = vmatprep.mubr.bf16.mxu0 %v121_v13  ;;  %v3926_v38 = vmov 0.0  }
 0x10c   :  { %v3225_v33 = vpop.f32.mrf.mxu0  ;;  %3538 = vmatpush3.bf16.msra.mxu1 %v3824_v44  ;;  %3517 = vmatprep.subr.bf16.mxu0 %v3825_v45 }
 0x10d   :  { %v3247_v34 = vpop.f32.mrf.mxu1  ;;  %v3970_v42 = vadd.f32 %v3245_v21, %v2214_v39  ;;  %3539 = vmatprep.subr.bf16.mxu1 %v3826_v46  ;;  %v122_v21 = vpack.c.bf16 %v90_v16, %v90_v16  ;;  %2811 = vmatprep.mubr.bf16.mxu1 %v123_v19  ;;  %v3850_v39 = vld [vmem:[#allocation6 + $0x30] sm:$0xff]  }
 0x10f   :  { %3518 = vmatpush3.bf16.msra.mxu0 %v3827_v47 }
 0x110   :  { %3540 = vmatpush3.bf16.msra.mxu1 %v3828_v48  ;;  %3519 = vmatprep.subr.bf16.mxu0 %v3829_v49 }
 0x111   :  { %3541 = vmatprep.subr.bf16.mxu1 %v3830_v50 }
 0x113   :  { %3520 = vmatpush3.bf16.msra.mxu0 %v3831_v51 }
 0x114   :  { %3542 = vmatpush3.bf16.msra.mxu1 %v3832_v52  ;;  %3521 = vmatprep.subr.bf16.mxu0 %v3833_v53 }
 0x115   :  { %3543 = vmatprep.subr.bf16.mxu1 %v3834_v54  ;;  %v3854_v54 = vld [vmem:[#allocation6 + $0x10] sm:$0xff]  }
 0x117   :  { %3522 = vmatpush3.bf16.msra.mxu0 %v3835_v55 }
 0x118   :  { %3544 = vmatpush3.bf16.msra.mxu1 %v3836_v56  ;;  %3523 = vmatprep.subr.bf16.mxu0 %v3837_v57  ;;  %v3855_v56 = vld [vmem:[#allocation6 + $0x8] sm:$0xff]   ;;  %v3856_v57 = vld [vmem:[#allocation6] sm:$0xff]  }
 0x119   :  { %3545 = vmatprep.subr.bf16.mxu1 %v3838_v58 }
 0x11b   :  { %3524 = vmatpush3.bf16.msra.mxu0 %v3839_v59 }
 0x11c   :  { %3546 = vmatpush3.bf16.msra.mxu1 %v3840_v60  ;;  %3525 = vmatprep.subr.bf16.mxu0 %v3841_v61 }
 0x11d   :  { %3547 = vmatprep.subr.bf16.mxu1 %v3842_v62 }
 0x11f   :  { %3526 = vmatpush3.bf16.msra.mxu0 %v3843_v63 }
 0x120   :  { %3548 = vmatpush3.bf16.msra.mxu1 %v3844_v0  ;;  %3527 = vmatprep.subr.bf16.mxu0 %v3845_v2 }
 0x121   :  { %3549 = vmatprep.subr.bf16.mxu1 %v3846_v4 }
 0x123   :  { %3528 = vmatpush3.bf16.msra.mxu0 %v3847_v6 }
 0x124   :  { %3550 = vmatpush3.bf16.msra.mxu1 %v3848_v9  ;;  %3566 = vmatprep.subr.bf16.mxu0 %v3926_v38 }
 0x126   :  { %v3265_v1 = vpop.f32.mrf.mxu0  ;;  %2772 = vmatmul.mubr.bf16.vlgmr.msra.gmra.mxu0 %v120_v20 }
 0x127   :  { %v3287_v3 = vpop.f32.mrf.mxu1  ;;  %2812 = vmatmul.mubr.bf16.vlgmr.msra.gmra.mxu1 %v122_v21  ;;  %3567 = vmatpush3.bf16.msra.mxu0 %v3849_v37 }
 0x128   :  { %v3266_v5 = vpop.f32.mrf.mxu0  ;;  %3568 = vmatprep.subr.bf16.mxu0 %v3926_v38  ;;  %3582 = vmatprep.mubr.msk.bf16.mxu0 %vm3927_vm0, %v3926_v38 }
 0x129   :  { %v3267_v7 = vadd.f32 %v3266_v5, %v3265_v1  ;;  %v3288_v8 = vpop.f32.mrf.mxu1 }
 0x12a   :  { %v3289_v11 = vadd.f32 %v3288_v8, %v3287_v3  ;;  %v3268_v12 = vpop.f32.mrf.mxu0 }
 0x12b   :  { %v2294_v17 = vadd.f32 %v3267_v7, %v3970_v42  ;;  %v3290_v18 = vpop.f32.mrf.mxu1  ;;  %3569 = vmatpush3.bf16.msra.mxu0 %v3850_v39  ;;  %v3853_v42 = vld [vmem:[#allocation6 + $0x18] sm:$0xff]  }
 0x12c   :  { %v3269_v22 = vpop.f32.mrf.mxu0  ;;  %3570 = vmatprep.subr.bf16.mxu0 %v3926_v38 }
 0x12d   :  { %v2334_v23 = vadd.f32 %v3289_v11, %v2294_v17  ;;  %v3291_v24 = vpop.f32.mrf.mxu1 }
 0x12f   :  { %3571 = vmatpush3.bf16.msra.mxu0 %v3851_v40 }
 0x130   :  { %3572 = vmatprep.subr.bf16.mxu0 %v3926_v38 }
 0x133   :  { %3573 = vmatpush3.bf16.msra.mxu0 %v3852_v41 }
 0x134   :  { %3574 = vmatprep.subr.bf16.mxu0 %v3926_v38 }
 0x137   :  { %3575 = vmatpush3.bf16.msra.mxu0 %v3853_v42 }
 0x138   :  { %3576 = vmatprep.subr.bf16.mxu0 %v3926_v38 }
 0x13b   :  { %3577 = vmatpush3.bf16.msra.mxu0 %v3854_v54 }
 0x13c   :  { %3578 = vmatprep.subr.bf16.mxu0 %v3926_v38 }
 0x13f   :  { %3579 = vmatpush3.bf16.msra.mxu0 %v3855_v56 }
 0x140   :  { %3580 = vmatprep.subr.bf16.mxu0 %v3926_v38 }
 0x143   :  { %3581 = vmatpush3.bf16.msra.mxu0 %v3856_v57 }
 0x146   :  { %v3309_v25 = vpop.f32.mrf.mxu0 }
 0x147   :  { %v3331_v26 = vpop.f32.mrf.mxu1 }
 0x148   :  { %v3310_v27 = vpop.f32.mrf.mxu0 }
 0x149   :  { %v3311_v28 = vadd.f32 %v3310_v27, %v3309_v25  ;;  %v3332_v29 = vpop.f32.mrf.mxu1 }
 0x14a   :  { %v3333_v30 = vadd.f32 %v3332_v29, %v3331_v26  ;;  %v3312_v31 = vpop.f32.mrf.mxu0 }
 0x14b   :  { %v2374_v32 = vadd.f32 %v3311_v28, %v2334_v23  ;;  %v3334_v33 = vpop.f32.mrf.mxu1 }
 0x14c   :  { %v3313_v34 = vpop.f32.mrf.mxu0 }
 0x14d   :  { %v2414_v35 = vadd.f32 %v3333_v30, %v2374_v32  ;;  %v3335_v36 = vpop.f32.mrf.mxu1 }
 0x166   :  { %v3353_v43 = vpop.f32.mrf.mxu0 }
 0x167   :  { %v3375_v44 = vpop.f32.mrf.mxu1 }
 0x168   :  { %v3354_v45 = vpop.f32.mrf.mxu0 }
 0x169   :  { %v3376_v46 = vpop.f32.mrf.mxu1  ;;  %v3355_v47 = vadd.f32 %v3354_v45, %v3353_v43 }
 0x16a   :  { %v3377_v48 = vadd.f32 %v3376_v46, %v3375_v44  ;;  %v3356_v49 = vpop.f32.mrf.mxu0  ;;  %v3196_v44 = vld [vmem:[%s3983_s4] ss:$0 sm:$0xff] }
 0x16b   :  { %v3378_v50 = vpop.f32.mrf.mxu1  ;;  %v2454_v51 = vadd.f32 %v3355_v47, %v2414_v35 }
 0x16c   :  { %v3357_v52 = vpop.f32.mrf.mxu0 }
 0x16d   :  { %v3379_v53 = vpop.f32.mrf.mxu1  ;;  %v2494_v55 = vadd.f32 %v3377_v48, %v2454_v51 }
 0x186   :  { %v3397_v58 = vpop.f32.mrf.mxu0 }
 0x187   :  { %v3419_v59 = vpop.f32.mrf.mxu1 }
 0x188   :  { %v3398_v60 = vpop.f32.mrf.mxu0 }
 0x189   :  { %v3399_v61 = vadd.f32 %v3398_v60, %v3397_v58  ;;  %v3420_v62 = vpop.f32.mrf.mxu1 }
 0x18a   :  { %v3421_v63 = vadd.f32 %v3420_v62, %v3419_v59  ;;  %v3400_v0 = vpop.f32.mrf.mxu0 }
 0x18b   :  { %v2534_v1 = vadd.f32 %v3399_v61, %v2494_v55  ;;  %v3422_v2 = vpop.f32.mrf.mxu1 }
 0x18c   :  { %v3401_v3 = vpop.f32.mrf.mxu0 }
 0x18d   :  { %v2574_v4 = vadd.f32 %v3421_v63, %v2534_v1  ;;  %v3423_v5 = vpop.f32.mrf.mxu1 }
 0x1a6   :  { %v3441_v6 = vpop.f32.mrf.mxu0 }
 0x1a7   :  { %v3463_v7 = vpop.f32.mrf.mxu1 }
 0x1a8   :  { %v3442_v8 = vpop.f32.mrf.mxu0 }
 0x1a9   :  { %v3464_v9 = vpop.f32.mrf.mxu1  ;;  %v3443_v22 = vadd.f32 %v3442_v8, %v3441_v6 }
 0x1aa   :  { %v3444_v10 = vpop.f32.mrf.mxu0  ;;  %v3465_v24 = vadd.f32 %v3464_v9, %v3463_v7 }
 0x1ab   :  { %v3466_v11 = vpop.f32.mrf.mxu1  ;;  %v2614_v23 = vadd.f32 %v3443_v22, %v2574_v4 }
 0x1ac   :  { %v3445_v12 = vpop.f32.mrf.mxu0 }
 0x1ad   :  { %v3467_v13 = vpop.f32.mrf.mxu1  ;;  %v2654_v26 = vadd.f32 %v3465_v24, %v2614_v23 }
 0x1c6   :  { %v3485_v14 = vpop.f32.mrf.mxu0 }
 0x1c7   :  { %v3507_v15 = vpop.f32.mrf.mxu1 }
 0x1c8   :  { %v3486_v16 = vpop.f32.mrf.mxu0 }
 0x1c9   :  { %v3508_v17 = vpop.f32.mrf.mxu1  ;;  %v3487_v25 = vadd.f32 %v3486_v16, %v3485_v14 }
 0x1ca   :  { %v3488_v18 = vpop.f32.mrf.mxu0  ;;  %v3509_v28 = vadd.f32 %v3508_v17, %v3507_v15 }
 0x1cb   :  { %v3510_v19 = vpop.f32.mrf.mxu1  ;;  %v2694_v27 = vadd.f32 %v3487_v25, %v2654_v26 }
 0x1cc   :  { %v3489_v20 = vpop.f32.mrf.mxu0 }
 0x1cd   :  { %v3511_v21 = vpop.f32.mrf.mxu1  ;;  %v2734_v32 = vadd.f32 %v3509_v28, %v2694_v27 }
 0x1e6   :  { %v3529_v29 = vpop.f32.mrf.mxu0 }
 0x1e7   :  { %v3551_v30 = vpop.f32.mrf.mxu1 }
 0x1e8   :  { %v3530_v31 = vpop.f32.mrf.mxu0 }
 0x1e9   :  { %v3531_v33 = vadd.f32 %v3530_v31, %v3529_v29  ;;  %v3552_v34 = vpop.f32.mrf.mxu1 }
 0x1ea   :  { %v3532_v35 = vpop.f32.mrf.mxu0  ;;  %v3553_v37 = vadd.f32 %v3552_v34, %v3551_v30 }
 0x1eb   :  { %v2774_v36 = vadd.f32 %v3531_v33, %v2734_v32  ;;  %v3554_v38 = vpop.f32.mrf.mxu1 }
 0x1ec   :  { %v3533_v39 = vpop.f32.mrf.mxu0 }
 0x1ed   :  { %v2814_v40 = vadd.f32 %v3553_v37, %v2774_v36  ;;  %v3555_v41 = vpop.f32.mrf.mxu1 }
 0x1ef   :  { %v2819_v42 = vmax.f32 %v2814_v40, 0.0 }
 0x1f1   :  { %v2820_v43 = vpack.c.bf16 %v2819_v42, %v2819_v42 }
 0x1f3   :  { %3583 = vmatmul.mubr.bf16.vlgmr.msra.gmra.mxu0 %v2820_v43 }
 0x2b3   :  { %v2926_v45 = vpop.f32.mrf.mxu0 }
 0x2b4   :  { %v2927_v46 = vadd.f32 %v3196_v44, %v2926_v45 }
 0x2b5   :  { %v3584_v47 = vpop.f32.mrf.mxu0 }
 0x2b6   :  { %2932 = vst [vmem:[%s3984_s5] sm:$0xff] %v2927_v46 }
 0x2b7   :  { %v2929_v48 = vpop.f32.mrf.mxu0 }
 0x2b9   :  { %v3585_v49 = vpop.f32.mrf.mxu0 }
 0x2ba   :  { %2937 = vsyncpa [#allocation3], 1 }
 0x2bb   :  { %2938 = vsyncpa [#allocation5], 1 }

</bundles_post_ra>
